<compile_context>
chip_gen: v5e
topology: v5e:2x2
jax: 0.10.0
libtpu: 0.0.40
codegen_flags: <defaults>
</compile_context>

<pallas_src>
import jax
import jax.numpy as jnp
from jax.experimental import pallas as pl
from jax.experimental.pallas import tpu as pltpu


def _add_kernel(x_ref, y_ref, o_ref):
    # Elementwise hot path on the VPU; cast-in-kernel is free (hidden under DMA).
    o_ref[...] = x_ref[...].astype(o_ref.dtype) + y_ref[...].astype(o_ref.dtype)


# ~1 MiB per f32 block buffer (256K elements).  2 inputs + 1 output, each
# double-buffered -> ~6 MiB peak VMEM regardless of input size.
_TARGET_BLOCK_ELEMS = 256 * 1024


def _pick_lane_width(n):
    """Widest lane-multiple last dim that divides n exactly (no padding)."""
    for lane in (2048, 1024, 512, 256, 128):
        if n % lane == 0:
            return lane, False
    return 128, True  # fall back to minimal padding up to a multiple of 128


def dummy_criterion(x, y):
    """Forward pass of DummyCriterion: returns x + y."""
    assert x.shape == y.shape, "DummyCriterion expects same-shaped inputs"
    # TODO(synk): PyTorch-style broadcasting of mismatched shapes is not supported.
    out_dtype = jnp.result_type(x.dtype, y.dtype)
    orig_shape = x.shape
    n = x.size

    lane, needs_pad = _pick_lane_width(n)
    if needs_pad:
        padded_n = -(-n // lane) * lane
        x_flat = jnp.pad(x.reshape(-1), (0, padded_n - n))
        y_flat = jnp.pad(y.reshape(-1), (0, padded_n - n))
    else:
        padded_n = n
        x_flat = x.reshape(-1)
        y_flat = y.reshape(-1)

    rows = padded_n // lane
    x2d = x_flat.reshape(rows, lane)
    y2d = y_flat.reshape(rows, lane)

    # Row tile: either the full row extent (small inputs, single grid step) or a
    # multiple of 8 sized for ~1 MiB blocks.  The (8, 128) layout constraint is
    # satisfied either way (full-extent block or 8/128-divisible block).
    tile_rows = min(rows, max(1, _TARGET_BLOCK_ELEMS // lane))
    if tile_rows < rows:
        tile_rows = max(8, (tile_rows // 8) * 8)
    grid = (pl.cdiv(rows, tile_rows),)

    out2d = pl.pallas_call(
        _add_kernel,
        out_shape=jax.ShapeDtypeStruct((rows, lane), out_dtype),
        grid_spec=pltpu.PrefetchScalarGridSpec(
            num_scalar_prefetch=0,
            grid=grid,
            in_specs=[
                pl.BlockSpec((tile_rows, lane), lambda i: (i, 0)),
                pl.BlockSpec((tile_rows, lane), lambda i: (i, 0)),
            ],
            out_specs=pl.BlockSpec((tile_rows, lane), lambda i: (i, 0)),
        ),
        compiler_params=pltpu.CompilerParams(
            # Independent elementwise tiles -> shardable across v7x's 2 TCs.
            dimension_semantics=("parallel",),
        ),
    )(x2d, y2d)

    out_flat = out2d.reshape(-1)
    if needs_pad:
        out_flat = out_flat[:n]
    return out_flat.reshape(orig_shape)


if __name__ == "__main__":
    key = jax.random.PRNGKey(0)
    kx, ky = jax.random.split(key)
    # Small NCHW-shaped inputs consistent with a typical criterion call.
    x = jax.random.normal(kx, (2, 4, 16, 16), dtype=jnp.float32)
    y = jax.random.normal(ky, (2, 4, 16, 16), dtype=jnp.float32)

    out = dummy_criterion(x, y)
    jax.block_until_ready(out)

    # Correctness check against the pure-JAX reference.
    ref = x + y
    assert out.shape == ref.shape and out.dtype == ref.dtype
    assert jnp.allclose(out, ref, atol=1e-6, rtol=1e-6)

    print("KERNEL_OK")
</pallas_src>

<mosaic_0001>
module attributes {stable_mosaic.version = 11 : i64} {
  func.func @_add_kernel(%arg0: i32, %arg1: memref<1x2048xf32, #tpu.memory_space<vmem>>, %arg2: memref<1x2048xf32, #tpu.memory_space<vmem>>, %arg3: memref<1x2048xf32, #tpu.memory_space<vmem>>) attributes {dimension_semantics = [#tpu.dimension_semantics<parallel>], iteration_bounds = array<i64: 1>, scalar_prefetch = 0 : i64, scratch_operands = 0 : i64, tpu.core_type = #tpu.core_type<tc>, window_params = [{transform_indices = @transform_0, window_bounds = array<i64: 1, 2048>}, {transform_indices = @transform_1, window_bounds = array<i64: 1, 2048>}, {transform_indices = @transform_2, window_bounds = array<i64: 1, 2048>}]} {
    %c0 = arith.constant 0 : index
    %c0_0 = arith.constant 0 : index
    %0 = vector.load %arg1[%c0, %c0_0] : memref<1x2048xf32, #tpu.memory_space<vmem>>, vector<1x2048xf32>
    %c0_1 = arith.constant 0 : index
    %c0_2 = arith.constant 0 : index
    %1 = vector.load %arg2[%c0_1, %c0_2] : memref<1x2048xf32, #tpu.memory_space<vmem>>, vector<1x2048xf32>
    %2 = arith.addf %0, %1 : vector<1x2048xf32>
    %c0_3 = arith.constant 0 : index
    %c0_4 = arith.constant 0 : index
    %3 = vector.load %arg3[%c0_3, %c0_4] : memref<1x2048xf32, #tpu.memory_space<vmem>>, vector<1x2048xf32>
    tpu.vector_store %arg3[%c0_3, %c0_4], %2 {strides = array<i32>} : memref<1x2048xf32, #tpu.memory_space<vmem>>, vector<1x2048xf32>,
    return
  }
  func.func @transform_0(%arg0: i32) -> (i32, i32) {
    %c0_i32 = arith.constant 0 : i32
    %c0_i32_0 = arith.constant 0 : i32
    return %arg0, %c0_i32 : i32, i32
  }
  func.func @transform_1(%arg0: i32) -> (i32, i32) {
    %c0_i32 = arith.constant 0 : i32
    %c0_i32_0 = arith.constant 0 : i32
    return %arg0, %c0_i32 : i32, i32
  }
  func.func @transform_2(%arg0: i32) -> (i32, i32) {
    %c0_i32 = arith.constant 0 : i32
    %c0_i32_0 = arith.constant 0 : i32
    return %arg0, %c0_i32 : i32, i32
  }
}

</mosaic_0001>

<bundles_post_ra>
// kernel: tpu_custom_call.1
= control target key start
LH: loop header
LB: loop body
LE: loop exit
PB: predicated region body
PF: predicated region fallthrough
CT: control target
= control target key end

     0   :  { %7 = vsyncpa [#allocation3], 0  ;;  %s174_s0 = inlined_call_operand.hbm [shape: f32[1,2048], index: 0, kind: input, shape index: {}]   ;;  %s175_s1 = inlined_call_operand.hbm [shape: f32[1,2048], index: 1, kind: input, shape index: {}]   ;;  %s176_s2 = inlined_call_operand.hbm [shape: f32[1,2048], index: 2, kind: output, shape index: {}]  }
   0x1   :  { %8 = vsyncpa [#allocation6], 0 }
   0x2   :  { %9 = vsyncpa [#allocation4], 0  ;;  %s15_s11 = sshll.u32 %s174_s0, 4  ;;  %s147_s12 = smov [#allocation2]   ;;  %s16_s11 = int_to_ptr.hbm [resolvable:$true] %s15_s11 }
   0x3   :  { %s17_s13 = sshll.u32 %s147_s12, 4  ;;  %s26_s16 = sshll.u32 %s175_s1, 4  ;;  %s18_s13 = int_to_ptr.vmem [resolvable:$true] %s17_s13  ;;  %s27_s16 = int_to_ptr.hbm [resolvable:$true] %s26_s16 }
   0x4   :  { %20 = dma.hbm_to_vmem [thread:$0]  %s16_s11, 256, %s18_s13, [#allocation3]  }
   0x5   :  { %s148_s17 = smov [#allocation5]  }
   0x6   :  { %s28_s18 = sshll.u32 %s148_s17, 4  ;;  %s29_s18 = int_to_ptr.vmem [resolvable:$true] %s28_s18 }
   0x7   :  { %31 = dma.hbm_to_vmem [thread:$0]  %s27_s16, 256, %s29_s18, [#allocation6]  }
   0x8   :  { %141 = dma.done.wait [#allocation3], 256  }
   0x9   :  { %142 = vsyncadd [#allocation3], 4294967040 }
   0xa   :  { %143 = dma.done.wait [#allocation6], 256  }
   0xb   :  { %144 = vsyncadd [#allocation6], 4294967040  ;;  %s149_s19 = smov [#allocation7]   ;;  %s55_s22 = sshll.u32 %s176_s2, 4  ;;  %v40_v0 = vld [vmem:[#allocation2] sm:$0xff]  ;;  %v42_v1 = vld [vmem:[#allocation5] sm:$0xff]  ;;  %s56_s22 = int_to_ptr.hbm [resolvable:$true] %s55_s22 }
   0xc   :  { %s53_s0 = sshll.u32 %s149_s19, 4  ;;  %v41_v2 = vld [vmem:[#allocation2 + $0x8] sm:$0xff]  ;;  %v44_v3 = vadd.f32 %v42_v1, %v40_v0  ;;  %v43_v4 = vld [vmem:[#allocation5 + $0x8] sm:$0xff]  ;;  %s54_s0 = int_to_ptr.vmem [resolvable:$true] %s53_s0 }
   0xd   :  { %v45_v5 = vadd.f32 %v43_v4, %v41_v2 }
   0xe   :  { %46 = vst [vmem:[#allocation7] sm:$0xff] %v44_v3 }
   0xf   :  { %47 = vst [vmem:[#allocation7 + $0x8] sm:$0xff] %v45_v5 }
  0x10   :  { %58 = dma.vmem_to_hbm [thread:$0]  %s54_s0, 256, %s56_s22, [#allocation4]  }
  0x11   :  { %145 = dma.done.wait [#allocation4], 256  }
  0x12   :  { %146 = vsyncadd [#allocation4], 4294967040 }
  0x13   :  { %63 = vsyncpa [#allocation3], 1 }
  0x14   :  { %64 = vsyncpa [#allocation6], 1 }
  0x15   :  { %65 = vsyncpa [#allocation4], 1 }

</bundles_post_ra>
